<compile_context>
chip_gen: v6e
topology: v6e:2x2x1
jax: 0.10.0
libtpu: 0.0.40
codegen_flags: <defaults>
</compile_context>

<pallas_src>
import jax
import jax.numpy as jnp
from jax.experimental import pallas as pl
from jax.experimental.pallas import tpu as pltpu

_VMEM_TILE_BUDGET = 16 * 1024 * 1024   # bytes of tile-scaled VMEM we target
_VMEM_LIMIT_BYTES = 32 * 1024 * 1024   # scoped VMEM limit requested from Mosaic


def _attention_kernel(g_ref, x_ref, wg_ref, wx_ref, bgx_ref, wp_ref, bp_ref,
                      out_ref):
    """One (batch, pixel-tile) grid step.

    g_ref  : (1, F_g, TP)        x_ref : (1, F_l, TP)     out_ref : (1, F_l, TP)
    wg_ref : (F_int, F_g) bf16   wx_ref: (F_int, F_l) bf16   (BN folded)
    bgx_ref: (F_int, 1) f32 (bg + bx)   wp_ref: (1, F_int) bf16
    bp_ref : (1, 1) f32 scalar in SMEM.
    """
    cdt = wg_ref.dtype                                   # bf16 MXU input dtype
    g_blk = g_ref[0]                                     # (F_g, TP)
    x_blk = x_ref[0]                                     # (F_l, TP)

    # h = BN(Conv1x1(g)) + BN(Conv1x1(x)); BN folded, single combined bias.
    h = (jnp.dot(wg_ref[...], g_blk.astype(cdt),
                 preferred_element_type=jnp.float32)
         + jnp.dot(wx_ref[...], x_blk.astype(cdt),
                   preferred_element_type=jnp.float32)
         + bgx_ref[...])                                 # (F_int, TP) f32

    p = jnp.maximum(h, 0.0)                              # ReLU

    # psi = sigmoid(BN(Conv1x1(p))) -> folded into wp/bp ; (1, TP)
    psi = jnp.dot(wp_ref[...], p.astype(cdt),
                  preferred_element_type=jnp.float32) + bp_ref[0, 0]
    psi = jax.nn.sigmoid(psi)

    # out = x * psi: f32 multiply (safe on v5e), store in caller's dtype so
    # bf16 I/O halves HBM traffic when the surrounding model runs in bf16.
    out_ref[0] = (x_blk.astype(jnp.float32) * psi).astype(out_ref.dtype)


def _fold_bn(w, b, gamma, beta, mean, var, eps=1e-5):
    """Fold inference-mode BatchNorm into a pointwise conv (matmul) weight/bias.

    w: (C_in, C_out), b: (C_out,).  Returns folded (w, b)."""
    scale = gamma / jnp.sqrt(var + eps)                  # (C_out,)
    return w * scale[None, :], (b - mean) * scale + beta


def _round_up(a, b):
    return ((a + b - 1) // b) * b


def _choose_tile_p(P, N, F_g, F_l, F_int, in_itemsize, out_itemsize):
    """Largest lane-dense pixel tile that fits the VMEM budget, with no HBM
    padding pass and at least 2 grid steps (v7x has 2 TensorCores)."""
    per_px = (2 * (F_g + F_l) * in_itemsize        # double-buffered g/x blocks
              + 2 * F_l * out_itemsize             # double-buffered out block
              + 3 * F_int * 4                      # live f32 intermediates
              + (F_g + F_l + F_int) * 2)           # bf16 casts feeding the MXU
    max_tile = max(128, (_VMEM_TILE_BUDGET // per_px) // 128 * 128)

    if P <= max_tile:
        tile_p = P                                 # single block, no padding
    elif P % 128 == 0:
        # Largest multiple of 128 <= max_tile that divides P (no tail block).
        tile_p = 128
        t = max_tile
        while t >= 128:
            if P % t == 0:
                tile_p = t
                break
            t -= 128
    else:
        # Partial tail block: Pallas masks the out-of-range writes; each pixel
        # column is independent so no valid pixel is polluted.
        tile_p = max_tile

    # Guarantee >= 2 grid steps so dimension_semantics=("parallel","parallel")
    # can shard work across both v7x TensorCores even for N == 1.
    if N * pl.cdiv(P, tile_p) < 2 and P > 128:
        tile_p = min(tile_p, _round_up(pl.cdiv(P, 2), 128))
    return tile_p


def attention_block(g, x, params):
    """g, x: NCHW arrays. Returns x * psi, same shape/dtype as x."""
    N, F_g, H, W = g.shape
    _, F_l, _, _ = x.shape
    F_int = params["wg"].shape[1]
    P = H * W

    # Fold BN into the 1x1 convs (inference mode).
    wg, bg = _fold_bn(params["wg"], params["bg"], params["bn_g_gamma"],
                      params["bn_g_beta"], params["bn_g_mean"], params["bn_g_var"])
    wx, bx = _fold_bn(params["wx"], params["bx"], params["bn_x_gamma"],
                      params["bn_x_beta"], params["bn_x_mean"], params["bn_x_var"])
    wp, bp = _fold_bn(params["wp"], params["bp"], params["bn_p_gamma"],
                      params["bn_p_beta"], params["bn_p_mean"], params["bn_p_var"])

    # W^T so channels-out land on sublanes; bf16 weights => single-pass bf16
    # MXU matmul with f32 accumulation (f32 matmul is emulated on all gens).
    wg_t = wg.T.astype(jnp.bfloat16)                     # (F_int, F_g)
    wx_t = wx.T.astype(jnp.bfloat16)                     # (F_int, F_l)
    wp_t = wp.T.astype(jnp.bfloat16)                     # (1, F_int)
    bgx = (bg + bx).astype(jnp.float32).reshape(F_int, 1)   # combined bias
    bp_s = bp.astype(jnp.float32).reshape(1, 1)              # scalar -> SMEM

    # NCHW -> (N, C, H*W): free reshape, no transpose / pad / extra HBM pass.
    g_r = g.reshape(N, F_g, P)
    x_r = x.reshape(N, F_l, P)

    in_isz = jnp.dtype(x.dtype).itemsize
    tile_p = _choose_tile_p(P, N, F_g, F_l, F_int, in_isz, in_isz)
    grid = (N, pl.cdiv(P, tile_p))

    # Advisory cost hint for XLA scheduling around this mem-bound custom call.
    flops = 2 * N * P * F_int * (F_g + F_l + 1) + 4 * N * P * F_int
    bytes_accessed = (N * P * (F_g + F_l) * jnp.dtype(g.dtype).itemsize
                      + N * P * F_l * jnp.dtype(x.dtype).itemsize)
    cost = pl.CostEstimate(flops=flops, transcendentals=N * P,
                           bytes_accessed=bytes_accessed)

    out_r = pl.pallas_call(
        _attention_kernel,
        out_shape=jax.ShapeDtypeStruct((N, F_l, P), x.dtype),
        grid_spec=pltpu.PrefetchScalarGridSpec(
            num_scalar_prefetch=0,
            grid=grid,
            in_specs=[
                pl.BlockSpec((1, F_g, tile_p), lambda n, p: (n, 0, p)),   # g tile
                pl.BlockSpec((1, F_l, tile_p), lambda n, p: (n, 0, p)),   # x tile
                pl.BlockSpec((F_int, F_g), lambda n, p: (0, 0)),          # Wg^T
                pl.BlockSpec((F_int, F_l), lambda n, p: (0, 0)),          # Wx^T
                pl.BlockSpec((F_int, 1), lambda n, p: (0, 0)),            # bg + bx
                pl.BlockSpec((1, F_int), lambda n, p: (0, 0)),            # Wp^T
                pl.BlockSpec(memory_space=pltpu.MemorySpace.SMEM),        # bp
            ],
            out_specs=pl.BlockSpec((1, F_l, tile_p), lambda n, p: (n, 0, p)),
        ),
        compiler_params=pltpu.CompilerParams(
            dimension_semantics=("parallel", "parallel"),
            vmem_limit_bytes=_VMEM_LIMIT_BYTES),
        cost_estimate=cost,
    )(g_r, x_r, wg_t, wx_t, bgx, wp_t, bp_s)

    return out_r.reshape(N, F_l, H, W)                   # NCHW, free reshape


def make_params(key, F_g, F_l, F_int):
    """Deterministic synthetic parameters (PyTorch conv (Cout,Cin,1,1) stored
    here transposed as (Cin, Cout) for matmul)."""
    ks = jax.random.split(key, 12)
    return {
        "wg": 0.1 * jax.random.normal(ks[0], (F_g, F_int), jnp.float32),
        "bg": 0.1 * jax.random.normal(ks[1], (F_int,), jnp.float32),
        "wx": 0.1 * jax.random.normal(ks[2], (F_l, F_int), jnp.float32),
        "bx": 0.1 * jax.random.normal(ks[3], (F_int,), jnp.float32),
        "wp": 0.1 * jax.random.normal(ks[4], (F_int, 1), jnp.float32),
        "bp": 0.1 * jax.random.normal(ks[5], (1,), jnp.float32),
        # BatchNorm (inference-mode) params / running stats
        "bn_g_gamma": 1.0 + 0.1 * jax.random.normal(ks[6], (F_int,), jnp.float32),
        "bn_g_beta": 0.1 * jax.random.normal(ks[7], (F_int,), jnp.float32),
        "bn_g_mean": 0.05 * jax.random.normal(ks[8], (F_int,), jnp.float32),
        "bn_g_var": jnp.abs(1.0 + 0.1 * jax.random.normal(ks[9], (F_int,), jnp.float32)),
        "bn_x_gamma": 1.0 + 0.1 * jax.random.normal(ks[10], (F_int,), jnp.float32),
        "bn_x_beta": 0.1 * jax.random.normal(ks[11], (F_int,), jnp.float32),
        "bn_x_mean": jnp.zeros((F_int,), jnp.float32),
        "bn_x_var": jnp.ones((F_int,), jnp.float32),
        "bn_p_gamma": jnp.ones((1,), jnp.float32),
        "bn_p_beta": jnp.zeros((1,), jnp.float32),
        "bn_p_mean": jnp.zeros((1,), jnp.float32),
        "bn_p_var": jnp.ones((1,), jnp.float32),
    }


def _reference(g, x, params):
    """Pure-JAX f32 reference of the same (BN folded, inference mode) forward."""
    wg, bg = _fold_bn(params["wg"], params["bg"], params["bn_g_gamma"],
                      params["bn_g_beta"], params["bn_g_mean"], params["bn_g_var"])
    wx, bx = _fold_bn(params["wx"], params["bx"], params["bn_x_gamma"],
                      params["bn_x_beta"], params["bn_x_mean"], params["bn_x_var"])
    wp, bp = _fold_bn(params["wp"], params["bp"], params["bn_p_gamma"],
                      params["bn_p_beta"], params["bn_p_mean"], params["bn_p_var"])
    g_t = g.transpose(0, 2, 3, 1)
    x_t = x.transpose(0, 2, 3, 1)
    g1 = g_t @ wg + bg
    x1 = x_t @ wx + bx
    p = jnp.maximum(g1 + x1, 0.0)
    psi = jax.nn.sigmoid(p @ wp + bp)
    return (x_t * psi).transpose(0, 3, 1, 2)


if __name__ == "__main__":
    # Small shapes consistent with the module: N=2, F_g=F_l=4, F_int=32, 16x16.
    N, F_g, F_l, F_int, H, W = 2, 4, 4, 32, 16, 16
    key = jax.random.PRNGKey(0)
    kg, kx, kp = jax.random.split(key, 3)
    g = jax.random.normal(kg, (N, F_g, H, W), jnp.float32)
    x = jax.random.normal(kx, (N, F_l, H, W), jnp.float32)
    params = make_params(kp, F_g, F_l, F_int)

    out = jax.block_until_ready(attention_block(g, x, params))
    ref = _reference(g, x, params)

    assert out.shape == x.shape, (out.shape, x.shape)
    # bf16 MXU inputs with f32 accumulation -> loosened tolerance vs f32 ref.
    err = float(jnp.max(jnp.abs(out - ref)))
    assert err < 2e-2, err
    print("KERNEL_OK")
</pallas_src>

<mosaic_0001>
module attributes {stable_mosaic.version = 11 : i64} {
  func.func @_attention_kernel(%arg0: i32, %arg1: i32, %arg2: memref<1x4x256xf32, #tpu.memory_space<vmem>>, %arg3: memref<1x4x256xf32, #tpu.memory_space<vmem>>, %arg4: memref<32x4xbf16, #tpu.memory_space<vmem>>, %arg5: memref<32x4xbf16, #tpu.memory_space<vmem>>, %arg6: memref<32x1xf32, #tpu.memory_space<vmem>>, %arg7: memref<1x32xbf16, #tpu.memory_space<vmem>>, %arg8: memref<1x1xf32, #tpu.memory_space<smem>>, %arg9: memref<1x4x256xf32, #tpu.memory_space<vmem>>) attributes {dimension_semantics = [#tpu.dimension_semantics<parallel>, #tpu.dimension_semantics<parallel>], iteration_bounds = array<i64: 2, 1>, scalar_prefetch = 0 : i64, scratch_operands = 0 : i64, tpu.core_type = #tpu.core_type<tc>, window_params = [{transform_indices = @transform_0, window_bounds = array<i64: 1, 4, 256>}, {transform_indices = @transform_1, window_bounds = array<i64: 1, 4, 256>}, {pipeline_mode = #tpu.pipeline_mode<synchronous>, transform_indices = @transform_2, window_bounds = array<i64: 32, 4>}, {pipeline_mode = #tpu.pipeline_mode<synchronous>, transform_indices = @transform_3, window_bounds = array<i64: 32, 4>}, {pipeline_mode = #tpu.pipeline_mode<synchronous>, transform_indices = @transform_4, window_bounds = array<i64: 32, 1>}, {pipeline_mode = #tpu.pipeline_mode<synchronous>, transform_indices = @transform_5, window_bounds = array<i64: 1, 32>}, {transform_indices = @transform_6, window_bounds = array<i64: 1, 1>}, {transform_indices = @transform_7, window_bounds = array<i64: 1, 4, 256>}]} {
    %c0 = arith.constant 0 : index
    %c0_0 = arith.constant 0 : index
    %c0_1 = arith.constant 0 : index
    %0 = vector.load %arg2[%c0, %c0_0, %c0_1] : memref<1x4x256xf32, #tpu.memory_space<vmem>>, vector<1x4x256xf32>
    %1 = vector.shape_cast %0 : vector<1x4x256xf32> to vector<4x256xf32>
    %c0_2 = arith.constant 0 : index
    %c0_3 = arith.constant 0 : index
    %c0_4 = arith.constant 0 : index
    %2 = vector.load %arg3[%c0_2, %c0_3, %c0_4] : memref<1x4x256xf32, #tpu.memory_space<vmem>>, vector<1x4x256xf32>
    %3 = vector.shape_cast %2 : vector<1x4x256xf32> to vector<4x256xf32>
    %c0_5 = arith.constant 0 : index
    %c0_6 = arith.constant 0 : index
    %4 = vector.load %arg4[%c0_5, %c0_6] : memref<32x4xbf16, #tpu.memory_space<vmem>>, vector<32x4xbf16>
    %5 = arith.truncf %1 : vector<4x256xf32> to vector<4x256xbf16>
    %cst = arith.constant dense<0.000000e+00> : vector<32x256xf32>
    %6 = tpu.matmul %4, %5, %cst {dimension_numbers = #tpu.dot_dimension_numbers<[1], [0], [0], [1], [0, 0, 1, 1], [], []>} : vector<32x4xbf16>, vector<4x256xbf16>, vector<32x256xf32> -> vector<32x256xf32>
    %c0_7 = arith.constant 0 : index
    %c0_8 = arith.constant 0 : index
    %7 = vector.load %arg5[%c0_7, %c0_8] : memref<32x4xbf16, #tpu.memory_space<vmem>>, vector<32x4xbf16>
    %8 = arith.truncf %3 : vector<4x256xf32> to vector<4x256xbf16>
    %cst_9 = arith.constant dense<0.000000e+00> : vector<32x256xf32>
    %9 = tpu.matmul %7, %8, %cst_9 {dimension_numbers = #tpu.dot_dimension_numbers<[1], [0], [0], [1], [0, 0, 1, 1], [], []>} : vector<32x4xbf16>, vector<4x256xbf16>, vector<32x256xf32> -> vector<32x256xf32>
    %10 = arith.addf %6, %9 : vector<32x256xf32>
    %c0_10 = arith.constant 0 : index
    %c0_11 = arith.constant 0 : index
    %11 = vector.load %arg6[%c0_10, %c0_11] : memref<32x1xf32, #tpu.memory_space<vmem>>, vector<32x1xf32>
    %12 = vector.broadcast %11 : vector<32x1xf32> to vector<32x256xf32>
    %13 = arith.addf %10, %12 : vector<32x256xf32>
    %cst_12 = arith.constant 0.000000e+00 : f32
    %14 = vector.broadcast %cst_12 : f32 to vector<32x256xf32>
    %15 = arith.maximumf %13, %14 : vector<32x256xf32>
    %c0_13 = arith.constant 0 : index
    %c0_14 = arith.constant 0 : index
    %16 = vector.load %arg7[%c0_13, %c0_14] : memref<1x32xbf16, #tpu.memory_space<vmem>>, vector<1x32xbf16>
    %17 = arith.truncf %15 : vector<32x256xf32> to vector<32x256xbf16>
    %cst_15 = arith.constant dense<0.000000e+00> : vector<1x256xf32>
    %18 = tpu.matmul %16, %17, %cst_15 {dimension_numbers = #tpu.dot_dimension_numbers<[1], [0], [0], [1], [0, 0, 1, 1], [], []>} : vector<1x32xbf16>, vector<32x256xbf16>, vector<1x256xf32> -> vector<1x256xf32>
    %c0_16 = arith.constant 0 : index
    %c0_17 = arith.constant 0 : index
    %19 = memref.load %arg8[%c0_16, %c0_17] : memref<1x1xf32, #tpu.memory_space<smem>>
    %20 = vector.broadcast %19 : f32 to vector<1x256xf32>
    %21 = arith.addf %18, %20 : vector<1x256xf32>
    %22 = arith.negf %21 : vector<1x256xf32>
    %23 = math.exp %22 : vector<1x256xf32>
    %cst_18 = arith.constant 1.000000e+00 : f32
    %24 = vector.broadcast %cst_18 : f32 to vector<1x256xf32>
    %25 = arith.addf %24, %23 : vector<1x256xf32>
    %26 = arith.divf %24, %25 : vector<1x256xf32>
    %27 = vector.broadcast %26 : vector<1x256xf32> to vector<4x256xf32>
    %28 = arith.mulf %3, %27 : vector<4x256xf32>
    %c0_19 = arith.constant 0 : index
    %c0_20 = arith.constant 0 : index
    %c0_21 = arith.constant 0 : index
    %29 = vector.load %arg9[%c0_19, %c0_20, %c0_21] : memref<1x4x256xf32, #tpu.memory_space<vmem>>, vector<1x4x256xf32>
    %30 = vector.shape_cast %29 : vector<1x4x256xf32> to vector<4x256xf32>
    %31 = vector.shape_cast %28 : vector<4x256xf32> to vector<1x4x256xf32>
    tpu.vector_store %arg9[%c0_19, %c0_20, %c0_21], %31 {strides = array<i32>} : memref<1x4x256xf32, #tpu.memory_space<vmem>>, vector<1x4x256xf32>,
    return
  }
  func.func @transform_0(%arg0: i32, %arg1: i32) -> (i32, i32, i32) {
    %c0_i32 = arith.constant 0 : i32
    %c0_i32_0 = arith.constant 0 : i32
    return %arg0, %c0_i32, %arg1 : i32, i32, i32
  }
  func.func @transform_1(%arg0: i32, %arg1: i32) -> (i32, i32, i32) {
    %c0_i32 = arith.constant 0 : i32
    %c0_i32_0 = arith.constant 0 : i32
    return %arg0, %c0_i32, %arg1 : i32, i32, i32
  }
  func.func @transform_2(%arg0: i32, %arg1: i32) -> (i32, i32) {
    %c0_i32 = arith.constant 0 : i32
    %c0_i32_0 = arith.constant 0 : i32
    %c0_i32_1 = arith.constant 0 : i32
    return %c0_i32, %c0_i32_0 : i32, i32
  }
  func.func @transform_3(%arg0: i32, %arg1: i32) -> (i32, i32) {
    %c0_i32 = arith.constant 0 : i32
    %c0_i32_0 = arith.constant 0 : i32
    %c0_i32_1 = arith.constant 0 : i32
    return %c0_i32, %c0_i32_0 : i32, i32
  }
  func.func @transform_4(%arg0: i32, %arg1: i32) -> (i32, i32) {
    %c0_i32 = arith.constant 0 : i32
    %c0_i32_0 = arith.constant 0 : i32
    %c0_i32_1 = arith.constant 0 : i32
    return %c0_i32, %c0_i32_0 : i32, i32
  }
  func.func @transform_5(%arg0: i32, %arg1: i32) -> (i32, i32) {
    %c0_i32 = arith.constant 0 : i32
    %c0_i32_0 = arith.constant 0 : i32
    %c0_i32_1 = arith.constant 0 : i32
    return %c0_i32, %c0_i32_0 : i32, i32
  }
  func.func @transform_6(%arg0: i32, %arg1: i32) -> (i32, i32) {
    %c0_i32 = arith.constant 0 : i32
    %c0_i32_0 = arith.constant 0 : i32
    %c0_i32_1 = arith.constant 0 : i32
    return %c0_i32, %c0_i32_0 : i32, i32
  }
  func.func @transform_7(%arg0: i32, %arg1: i32) -> (i32, i32, i32) {
    %c0_i32 = arith.constant 0 : i32
    %c0_i32_0 = arith.constant 0 : i32
    return %arg0, %c0_i32, %arg1 : i32, i32, i32
  }
}

</mosaic_0001>

<bundles_post_ra>
// kernel: tpu_custom_call.1
= control target key start
LH: loop header
LB: loop body
LE: loop exit
PB: predicated region body
PF: predicated region fallthrough
CT: control target
= control target key end

     0   :  { %s1113_s0 = inlined_call_operand.vmem [shape: f32[2,4,256], index: 0, kind: input, shape index: {}]   ;;  %s1114_s1 = inlined_call_operand.vmem [shape: f32[2,4,256], index: 1, kind: input, shape index: {}]   ;;  %s1115_s2 = inlined_call_operand.vmem [shape: bf16[32,4], index: 2, kind: input, shape index: {}]   ;;  %s1116_s3 = inlined_call_operand.vmem [shape: bf16[32,4], index: 3, kind: input, shape index: {}]   ;;  %s1117_s4 = inlined_call_operand.vmem [shape: f32[32,1], index: 4, kind: input, shape index: {}]   ;;  %s1118_s5 = inlined_call_operand.vmem [shape: bf16[1,32], index: 5, kind: input, shape index: {}]   ;;  %s1119_s6 = inlined_call_operand.<no memory space> [shape: f32[1,1], index: 6, kind: input, shape index: {}]   ;;  %s1120_s7 = inlined_call_operand.hbm [shape: f32[2,4,256], index: 7, kind: output, shape index: {}]  }
   0x1   :  { %12 = sst [smem:[#allocation2]] %s1119_s6 }
   0x2   :  { %13 = vsyncpa [#allocation4], 0 }
   0x3   :  { %15 = vsyncpa [#allocation4 + $0x1], 0  ;;  %s973_s26 = smov 0   ;;  %s975_s27 = smov 0  }
   0x4   :  { %s977_s28 = smov 0   ;;  %s979_s29 = smov 0  }
   0x5   :  { %s981_s30 = smov 0   ;;  %s983_s8 = smov 0  }
   0x6 LB: > { %s747_s6 = sadd.s32 4294967295, %s926_s8   ;;  %s748_s9 = sadd.s32 4294967294, %s926_s8   ;;  %s926_s8 = sphi %s983_s8, %s21_s8   ;;  %s922_s30 = sphi %s981_s30, %s1127_s30   ;;  %s918_s29 = sphi %s979_s29, %s1126_s29   ;;  %s914_s28 = sphi %s977_s28, %s1125_s28   ;;  %s910_s27 = sphi %s975_s27, %s1124_s27   ;;  %s906_s26 = sphi %s973_s26, %s1123_s26  }
   0x7   : > { %s33_s10 = sadd.s32 1, %s922_s30  ;;  %s203_s11 = sadd.s32 1, %s914_s28 }
   0x8   : > { %p35_p0 = scmp.ge.s32.totalorder %s33_s10, 2  ;;  %p213_p1 = scmp.ne.s32.totalorder %s914_s28, %s910_s27 }
   0x9   : > { %p214_p2 = scmp.eq.s32.totalorder %s747_s6, 1  ;;  %p219_p3 = scmp.ne.s32.totalorder %s910_s27, %s906_s26 }
   0xa   : > { %s1129_s10 = smov (%p35_p0, %s33_s10), 0  ;;  %p220_p5 = scmp.eq.s32.totalorder %s748_s9, 1 }
   0xb   : > { %p1013_p4 = por %p214_p2, %p213_p1  ;;  %s198_s13 = ssub.s32 %s922_s30, %s1129_s10 }
   0xc   : > { %p751_p6 = scmp.ge.s32.totalorder %s926_s8, 1  ;;  %p201_p7 = scmp.eq.s32.totalorder %s198_s13, 0 }
   0xd   : > { %p1020_p8 = por %p220_p5, %p219_p3  ;;  %p279_p9 = scmp.lt.s32.totalorder %s926_s8, 3 }
   0xe   : > { %s1026_s15 = scalar_select %p201_p7, %s914_s28, %s203_s11  }
   0xf   : > { %p280_p10 = pnand %p751_p6, %p279_p9 }
  0x10   : > { %p325_p11 = scmp.lt.s32.totalorder (!%p280_p10), %s918_s29, 1  ;;  %s563_s11 = sld [smem:[#allocation2]] (!%p280_p10) }
  0x11   : > { %283 = sbr.rel (%p280_p10) target bundleno = 507 (0x1fb), region = 48  ;;  %s321_s13 = sand.u32 (!%p280_p10), 1, %s910_s27  }
  0x12   : > { %s637_s23 = scalar_lea.sflag (!%p280_p10), [#allocation4], %s321_s13 }
  0x16   : > { %v928_v0 = vmov 0   ;;  %s326_s16 = scalar_select %p325_p11, %s918_s29, 1  ;;  %v518_v1 = vld [vmem:[%s1117_s4] sm:$0xff]  ;;  %v520_v2 = vld [vmem:[%s1117_s4 + $0x10] sm:$0xff]  ;;  %vm383_vm0 = vcmask 1041408   ;;  %v519_v5 = vld [vmem:[%s1117_s4 + $0x8] sm:$0xff] }
  0x17   : > { %422 = vmatprep.mubr.bf16.mxu0 %v928_v0  ;;  %497 = vmatprep.mubr.bf16.mxu1 %v928_v0  ;;  %v521_v10 = vld [vmem:[%s1117_s4 + $0x18] sm:$0xff]  ;;  %v838_v15 = vld [vmem:[%s1116_s3] sm:$0xff]   ;;  %vm376_vm1 = vcmask 31744   ;;  %v840_v17 = vld [vmem:[%s1116_s3 + $0x8] sm:$0xff]   ;;  %vm565_vm2 = vcmask 261120  }
  0x18   : > { %835 = vset.pattern.permute.xlu1 %v928_v0  ;;  %834 = vset.pattern.permute.xlu0 %v928_v0  ;;  %s775_s17 = sshll.u32 %s326_s16, 3  ;;  %v839_v16 = vld [vmem:[%s1115_s2] sm:$0xff]   ;;  %v841_v18 = vld [vmem:[%s1115_s2 + $0x8] sm:$0xff]   ;;  %s752_s16 = sshll.u32 %s321_s13, 3 }
  0x19   : > { %s342_s22 = scalar_lea.vmem %s1114_s1, %s775_s17  ;;  %s332_s25 = scalar_lea.vmem %s1113_s0, %s775_s17  ;;  %524 = vperm.xlu1 %835, %v518_v1   ;;  %534 = vperm.xlu0 %834, %v520_v2  }
  0x1a   : > { %v1042_v3 = vld [vmem:[%s342_s22] sm:$0xff]  ;;  %s777_s17 = sshll.u32 %s918_s29, 7  ;;  %s323_s18 = scalar_lea.vmem [#allocation3], %s752_s16 }
  0x1b   : > { %v346_v4 = vld [vmem:[%s332_s25] sm:$0xff]  ;;  %v362_v6 = vcombine.high %v1042_v3, %v1042_v3  ;;  %v364_v8 = vpack.c.bf16 %v1042_v3, %v1042_v3  ;;  %s653_s19 = sshll.u32 %s323_s18, 4  ;;  %s651_s22 = scalar_lea.hbm %s1120_s7, %s777_s17  ;;  %s654_s19 = int_to_ptr.vmem [resolvable:$true] %s653_s19 }
  0x1c   : > { %v353_v7 = vcombine.high %v346_v4, %v346_v4  ;;  %v355_v9 = vpack.c.bf16 %v346_v4, %v346_v4  ;;  %v558_v4 = vld [vmem:[%s1118_s5] sm:$0x1]  ;;  %s850_s24 = scalar_lea.vmem %s654_s19, 128  ;;  %s929_s25 = smov [#allocation3]  }
  0x1d   : > { %v365_v11 = vpack.c.bf16 %v362_v6, %v362_v6  ;;  %v385_v13 = vsel %vm383_vm0, %v364_v8, 0  ;;  %529 = vperm.xlu1 %835, %v519_v5   ;;  %539 = vperm.xlu0 %834, %v521_v10   ;;  %v564_v5 = vstv %s563_s11  ;;  %p851_p12 = scmp.ne.s32.totalorder %s654_s19, %s850_s24  ;;  %s854_s6 = sshll.u32 %s929_s25, 4  ;;  %s855_s6 = int_to_ptr.vmem [resolvable:$false] %s854_s6 }
  0x1e   : > { %v356_v12 = vpack.c.bf16 %v353_v7, %v353_v7  ;;  %v460_v14 = vsel %vm383_vm0, %v355_v9, 0  ;;  %s856_s29 = scalar_lea.vmem %s855_s6, 256  ;;  %p857_p1 = scmp.lt.s32.totalorder %s654_s19, %s855_s6 }
  0x1f   : > { %759 = vmatprep.subr.msk.bf16.mxu0 %vm383_vm0, %v365_v11  ;;  %p852_p13 = pnand %p851_p12, %p1013_p4  ;;  %p858_p2 = scmp.lt.s32.totalorder %s856_s29, %s850_s24 }
  0x20   : > { %764 = vmatprep.subr.msk.bf16.mxu1 %vm383_vm0, %v356_v12  ;;  %405 = vmatpush1.bf16.msra.mxu0 %v385_v13 }
  0x21   : > { %480 = vmatpush1.bf16.msra.mxu1 %v460_v14  ;;  %p853_p0 = pneg %p852_p13  ;;  %p859_p3 = por %p858_p2, %p857_p1 }
  0x23   : > { %760 = vmatmul.mubr.msk.bf16.vlgmr.msra.gmra.mxu0 %vm376_vm1, %v838_v15  ;;  %p860_p5 = pnand %p859_p3, %p853_p0 }
  0x24   : > { %765 = vmatmul.mubr.msk.bf16.vlgmr.msra.gmra.mxu1 %vm376_vm1, %v839_v16  ;;  %432 = vmatprep.mubr.bf16.mxu0 %v928_v0 }
  0x25   : > { %507 = vmatprep.mubr.bf16.mxu1 %v928_v0 }
  0x2b   : > { %761 = vmatmul.mubr.msk.bf16.gmra.mxu0 %vm376_vm1, %v840_v17 }
  0x2c   : > { %766 = vmatmul.mubr.msk.bf16.gmra.mxu1 %vm376_vm1, %v841_v18  ;;  %601 = vmatprep.mubr.bf16.mxu0 %v928_v0  ;;  %v622_v18 = vlaneseq }
  0x94   : > { %v525_v27 = vpop.permute.xlu1 %524  ;;  %v535_v28 = vpop.permute.xlu0 %534 }
  0x98   : > { %v530_v39 = vpop.permute.xlu1 %529  ;;  %v540_v40 = vpop.permute.xlu0 %539 }
  0xe3   : > { %v424_v19 = vpop.f32.mrf.mxu0 }
  0xe4   : > { %v499_v20 = vpop.f32.mrf.mxu1 }
  0xe5   : > { %v426_v21 = vpop.f32.mrf.mxu0  ;;  %v500_v49 = vadd.f32 %v499_v20, %v424_v19  ;;  %v623_v19 = vshrl.u32 %v622_v18, 7 }
  0xe6   : > { %v501_v22 = vpop.f32.mrf.mxu1 }
  0xe7   : > { %v428_v23 = vpop.f32.mrf.mxu0  ;;  %v502_v38 = vadd.f32 %v501_v22, %v426_v21  ;;  %v542_v58 = vadd.f32 %v525_v27, %v500_v49  ;;  %v624_v20 = vsub.s32 0, %v623_v19 }
  0xe8   : > { %v503_v24 = vpop.f32.mrf.mxu1 }
  0xe9   : > { %v430_v25 = vpop.f32.mrf.mxu0  ;;  %v504_v42 = vadd.f32 %v503_v24, %v428_v23  ;;  %v543_v51 = vadd.f32 %v525_v27, %v502_v38  ;;  %v550_v1 = vmax.f32 %v542_v58, 0.0 }
  0xea   : > { %v505_v26 = vpop.f32.mrf.mxu1 }
  0xeb   : > { %v434_v29 = vpop.f32.mrf.mxu0  ;;  %v506_v33 = vadd.f32 %v505_v26, %v430_v25  ;;  %v544_v53 = vadd.f32 %v530_v39, %v504_v42  ;;  %v551_v60 = vmax.f32 %v543_v51, 0.0 }
  0xec   : > { %v509_v30 = vpop.f32.mrf.mxu1 }
  0xed   : > { %v436_v31 = vpop.f32.mrf.mxu0  ;;  %v510_v35 = vadd.f32 %v509_v30, %v434_v29  ;;  %v545_v45 = vadd.f32 %v530_v39, %v506_v33  ;;  %v552_v62 = vmax.f32 %v544_v53, 0.0 }
  0xee   : > { %v511_v32 = vpop.f32.mrf.mxu1 }
  0xef   : > { %v512_v34 = vadd.f32 %v511_v32, %v436_v31  ;;  %v438_v36 = vpop.f32.mrf.mxu0  ;;  %v546_v50 = vadd.f32 %v535_v28, %v510_v35  ;;  %v553_v55 = vmax.f32 %v545_v45, 0.0  ;;  %v559_v2 = vpack.c.bf16 %v552_v62, %v550_v1 }
  0xf0   : > { %v513_v37 = vpop.f32.mrf.mxu1 }
  0xf1   : > { %v514_v41 = vadd.f32 %v513_v37, %v438_v36  ;;  %v440_v43 = vpop.f32.mrf.mxu0  ;;  %v547_v46 = vadd.f32 %v535_v28, %v512_v34  ;;  %v554_v59 = vmax.f32 %v546_v50, 0.0  ;;  %v560_v0 = vpack.c.bf16 %v553_v55, %v551_v60 }
  0xf2   : > { %v515_v44 = vpop.f32.mrf.mxu1 }
  0xf3   : > { %v548_v47 = vadd.f32 %v540_v40, %v514_v41  ;;  %v516_v48 = vadd.f32 %v515_v44, %v440_v43  ;;  %v555_v56 = vmax.f32 %v547_v46, 0.0 }
  0xf5   : > { %v549_v52 = vadd.f32 %v540_v40, %v516_v48  ;;  %v556_v54 = vmax.f32 %v548_v47, 0.0 }
  0xf7   : > { %v557_v57 = vmax.f32 %v549_v52, 0.0  ;;  %v561_v63 = vpack.c.bf16 %v556_v54, %v554_v59 }
  0xf9   : > { %v562_v61 = vpack.c.bf16 %v557_v57, %v555_v56 }
  0xfb   : > { %581 = vmatprep.subr.bf16.mxu0 %v562_v61 }
  0xfc   : > { %582 = vmatpush1.bf16.msra.mxu0 %v561_v63 }
  0xfd   : > { %583 = vmatprep.subr.bf16.mxu0 %v560_v0 }
 0x100   : > { %584 = vmatpush1.bf16.msra.mxu0 %v559_v2 }
 0x103   : > { %767 = vmatmul.mubr.msk.bf16.vlgmr.msra.gmra.mxu0 %vm565_vm2, %v558_v4 }
 0x1c3   : > { %v603_v6 = vpop.f32.mrf.mxu0 }
 0x1c4   : > { %v604_v7 = vadd.f32 %v603_v6, %v564_v5 }
 0x1c5   : > { %v605_v8 = vpop.f32.mrf.mxu0 }
 0x1c6   : > { %v768_v9 = vmul.f32 -1.442695, %v604_v7  ;;  %v606_v10 = vadd.f32 %v605_v8, %v564_v5 }
 0x1c7   : > { %v607_v11 = vpop.f32.mrf.mxu0 }
 0x1c8   : > { %842 = vpow2.f32 %v768_v9  ;;  %v769_v12 = vmul.f32 -1.442695, %v606_v10 }
 0x1c9   : > { %v608_v13 = vpop.f32.mrf.mxu0 }
 0x1ca   : > { %844 = vpow2.f32 %v769_v12 }
 0x1d5   : > { %v843_v14 = vpop.eup %842 }
 0x1d6   : > { %v616_v15 = vadd.f32 1.0, %v843_v14 }
 0x1d7   : > { %v845_v16 = vpop.eup %844 }
 0x1d8   : > { %846 = vrcp.f32 %v616_v15  ;;  %v617_v17 = vadd.f32 1.0, %v845_v16 }
 0x1da   : > { %848 = vrcp.f32 %v617_v17 }
 0x1e5   : > { %v847_v21 = vpop.eup %846 }
 0x1e6   : > { %v625_v23 = vrot.slane %v847_v21, %v624_v20 }
 0x1e7   : > { %v849_v22 = vpop.eup %848 }
 0x1e8   : > { %v629_v24 = vrot.slane %v849_v22, %v624_v20 }
 0x1ea   : > { %v632_v25 = vcombine.low %v625_v23, %v629_v24 }
 0x1ec   : > { %v634_v26 = vmul.f32 %v632_v25, %v1042_v3 }
 0x1ee   : > { %635 = vst [vmem:[%s323_s18] sm:$0xff] %v634_v26 }
 0x1ef   : > { %863 = shalt.err (!%p860_p5)
}
 0x1f0   : > { %s864_s9 = scalar_lea.hbm %s651_s22, 128  ;;  %s868_s16 = scalar_lea.hbm %s1120_s7, 256 }
 0x1f1   : > { %p865_p6 = scmp.ne.s32.totalorder %s651_s22, %s864_s9  ;;  %p869_p10 = scmp.lt.s32.totalorder %s651_s22, %s1120_s7 }
 0x1f2   : > { %p870_p11 = scmp.lt.s32.totalorder %s868_s16, %s864_s9 }
 0x1f3   : > { %p866_p7 = pnand %p865_p6, %p1013_p4 }
 0x1f4   : > { %p871_p12 = por %p870_p11, %p869_p10 }
 0x1f5   : > { %p867_p9 = pneg %p866_p7 }
 0x1f7   : > { %p872_p13 = pnand %p871_p12, %p867_p9 }
 0x1f9   : > { %875 = shalt.err (!%p872_p13)
}
 0x1fa   : > { %778 = dma.vmem_to_hbm [thread:$0]  (%p1013_p4), %s654_s19, 128, %s651_s22, %s637_s23  }
 0x1fb PF: > { %p784_p0 = scmp.ge.s32.totalorder %s926_s8, 2  ;;  %s665_s20 = sand.u32 1, %s906_s26  }
 0x1fc   : > { %s666_s21 = scalar_lea.sflag [#allocation4], %s665_s20 }
 0x1fd   : > { %p781_p1 = pnand %p784_p0, %p1020_p8 }
 0x1ff   : > { %p782_p2 = pneg %p781_p1 }
 0x201   : > { %901 = dma.done.wait (%p782_p2), %s666_s21, 128  }
 0x202   : > { %903 = vsyncadd (%p782_p2), %s666_s21, 4294967168  ;;  %s21_s8 = sadd.s32 1, %s926_s8   ;;  %s1123_s26 = smov %s910_s27 }
 0x203   : > { %p18_p3 = scmp.ge.s32.totalorder %s21_s8, 4   ;;  %s1124_s27 = smov %s914_s28 }
 0x204   : > { %s1125_s28 = smov %s1026_s15  ;;  %s1126_s29 = smov %s922_s30 }
 0x205   : > { %s1127_s30 = smov %s1129_s10  ;;  %20 = sbr.rel (!%p18_p3) target bundleno = 6 (0x6), region = 86 }
 0x20a   :  { %671 = vsyncpa [#allocation4], 1 }
 0x20b   :  { %673 = vsyncpa [#allocation4 + $0x1], 1 }

</bundles_post_ra>
